<compile_context>
chip_gen: v5e
topology: v5e:2x2
jax: 0.10.0
libtpu: 0.0.40
codegen_flags: <defaults>
</compile_context>

<pallas_src>
import functools

import jax
import jax.numpy as jnp
from jax.experimental import pallas as pl
from jax.experimental.pallas import tpu as pltpu

_LANES = 128
_WORKING_SET_BUDGET_BYTES = 8 * 1024 * 1024   # dbuf input + live temps per step
_MAX_TILE_N = 2048
_VMEM_LIMIT_BYTES = 32 * 1024 * 1024


def _round_up(x: int, m: int) -> int:
    return ((x + m - 1) // m) * m


def _pow_static(w, gamma):
    """(1 - pt) ** gamma with a static (compile-time) gamma."""
    g = float(gamma)
    if g == 2.0:                      # module default: explicit square, no pow
        return w * w
    if g == 1.0:
        return w
    if g == 0.0:
        return jnp.ones_like(w)
    if g.is_integer() and 0.0 < g <= 8.0:
        r = w
        for _ in range(int(g) - 1):
            r = r * w
        return r
    return jnp.exp(g * jnp.log(jnp.maximum(w, 1e-30)))   # general fallback


def _focal_loss_kernel(logits_ref, targets_ref, alpha_t_ref, out_ref, *, gamma):
    """One (C, TILE_N) column block of samples -> (1, TILE_N) focal values."""
    logits = logits_ref[...]                   # (C, T) input dtype (f32/bf16)
    targets = targets_ref[...]                 # (1, T) int32
    alpha_t = alpha_t_ref[...]                 # (1, T) f32  (= alpha[targets])
    c, t = logits.shape

    # target-class selection mask (bool; never materialize an f32 one-hot)
    cls = jax.lax.broadcasted_iota(jnp.int32, (c, t), 0)
    is_tgt = cls == targets

    # numerically-stable log-sum-exp over the class (sublane) axis:
    # elementwise VPU combines + a short sublane reduce, no cross-lane XLU.
    m = jnp.max(logits, axis=0, keepdims=True)                    # (1, T)
    e = jnp.exp(logits - m)                                       # input dtype
    s = jnp.sum(e, axis=0, keepdims=True, dtype=jnp.float32)      # f32 accum
    lse = m.astype(jnp.float32) + jnp.log(s)                      # (1, T) f32

    # logit of the target class (exactly one selected element per column)
    tgt_logit = jnp.sum(jnp.where(is_tgt, logits, jnp.zeros_like(logits)),
                        axis=0, keepdims=True).astype(jnp.float32)

    ce = lse - tgt_logit                        # per-sample cross entropy
    pt = jnp.exp(-ce)                           # prob of the target class
    w = jnp.maximum(1.0 - pt, 0.0)              # clamp f32 round-off (pt > 1)
    out_ref[...] = alpha_t * _pow_static(w, gamma) * ce


def _choose_tile_n(n: int, c: int, in_itemsize: int) -> int:
    # per-lane working set: double-buffered input column, exp term, and a
    # couple of live i32/f32 (C,) temporaries.
    bytes_per_lane = c * (2 * in_itemsize + in_itemsize + 8) + 64
    t = _WORKING_SET_BUDGET_BYTES // max(1, bytes_per_lane)
    t = max(_LANES, (min(t, _MAX_TILE_N) // _LANES) * _LANES)
    # >= 2 grid steps whenever the batch allows it: v7x's two TensorCores
    # share the "parallel" grid axis (harmless on single-core v5e/v6e).
    t = min(t, _round_up(int(pl.cdiv(n, 2)), _LANES))
    return t


def focal_loss(logits, targets, alpha, *, gamma=2.0, tile_n=None):
    """Pallas-TPU FocalLoss forward.

    logits: (N, C) float (f32/bf16); targets: (N,) int; alpha: (C,) float.
    Returns the scalar mean focal loss (f32). `gamma` is compile-time static.
    """
    n, c = logits.shape
    targets = targets.astype(jnp.int32)

    # per-sample alpha gather done once by XLA (O(N), not O(N*C) in-kernel)
    alpha_t = alpha.astype(jnp.float32)[targets].reshape(1, n)

    # batch-on-lanes layout (layout plumbing only; no padding copy of logits)
    logits_t = logits.T                        # (C, N)
    targets2d = targets.reshape(1, n)

    if tile_n is None:
        tile_n = _choose_tile_n(n, c, jnp.dtype(logits.dtype).itemsize)
    else:
        tile_n = max(_LANES, (int(tile_n) // _LANES) * _LANES)
    if tile_n >= n:
        tile_n = n                             # single full-extent block
    num_tiles = int(pl.cdiv(n, tile_n))

    kernel = functools.partial(_focal_loss_kernel, gamma=gamma)

    per_sample = pl.pallas_call(
        kernel,
        out_shape=jax.ShapeDtypeStruct((1, n), jnp.float32),
        grid=(num_tiles,),
        in_specs=[
            pl.BlockSpec((c, tile_n), lambda i: (0, i)),   # logits^T tile
            pl.BlockSpec((1, tile_n), lambda i: (0, i)),   # targets tile
            pl.BlockSpec((1, tile_n), lambda i: (0, i)),   # alpha[targets] tile
        ],
        out_specs=pl.BlockSpec((1, tile_n), lambda i: (0, i)),
        compiler_params=pltpu.CompilerParams(
            dimension_semantics=("parallel",),
            vmem_limit_bytes=_VMEM_LIMIT_BYTES,
        ),
    )(logits_t, targets2d, alpha_t)

    # finish the mean in the wrapper; the output holds exactly N valid values
    return jnp.mean(per_sample)


def _reference(logits, targets, alpha, gamma=2.0):
    # pure-JAX reference of the PyTorch forward
    logp = jax.nn.log_softmax(logits.astype(jnp.float32), axis=-1)
    ce = -jnp.take_along_axis(logp, targets[:, None], axis=-1)[:, 0]
    pt = jnp.exp(-ce)
    return jnp.mean(alpha[targets] * (1.0 - pt) ** gamma * ce)


if __name__ == "__main__":
    key = jax.random.PRNGKey(0)
    k1, k2, k3, k4, k5 = jax.random.split(key, 5)

    # --- case 1: tiny batch, handful of classes (meta_cat regime), 1 tile ----
    N1, C1 = 8, 5
    logits1 = jax.random.normal(k1, (N1, C1), dtype=jnp.float32)
    targets1 = jax.random.randint(k2, (N1,), 0, C1, dtype=jnp.int32)
    alpha1 = jax.random.uniform(k3, (C1,), dtype=jnp.float32, minval=0.25, maxval=1.0)
    loss1 = focal_loss(logits1, targets1, alpha1)
    jax.block_until_ready(loss1)
    ref1 = _reference(logits1, targets1, alpha1)
    assert jnp.allclose(loss1, ref1, rtol=1e-5, atol=1e-5), (loss1, ref1)

    # --- case 2: multi-tile grid with a ragged last tile (no padding copy) ----
    N2, C2 = 300, 32
    logits2 = jax.random.normal(k4, (N2, C2), dtype=jnp.float32)
    targets2 = jax.random.randint(k5, (N2,), 0, C2, dtype=jnp.int32)
    alpha2 = jax.random.uniform(k3, (C2,), dtype=jnp.float32, minval=0.25, maxval=1.0)
    loss2 = focal_loss(logits2, targets2, alpha2, tile_n=128)   # 3 tiles, last has 44 valid lanes
    jax.block_until_ready(loss2)
    ref2 = _reference(logits2, targets2, alpha2)
    assert jnp.allclose(loss2, ref2, rtol=1e-5, atol=1e-5), (loss2, ref2)

    # --- case 3: bf16 logits stream as bf16 (no wrapper / full-tile upcast) ---
    loss3 = focal_loss(logits2.astype(jnp.bfloat16), targets2, alpha2, tile_n=128)
    jax.block_until_ready(loss3)
    ref3 = _reference(logits2.astype(jnp.bfloat16), targets2, alpha2)
    assert jnp.allclose(loss3, ref3, rtol=5e-2, atol=5e-2), (loss3, ref3)

    # --- case 4: default (working-set-budget) tile selection ------------------
    loss4 = focal_loss(logits2, targets2, alpha2)
    jax.block_until_ready(loss4)
    assert jnp.allclose(loss4, ref2, rtol=1e-5, atol=1e-5), (loss4, ref2)

    print("KERNEL_OK")
</pallas_src>

<mosaic_0001>
module attributes {stable_mosaic.version = 11 : i64} {
  func.func @_focal_loss_kernel(%arg0: i32, %arg1: memref<5x8xf32, #tpu.memory_space<vmem>>, %arg2: memref<1x8xi32, #tpu.memory_space<vmem>>, %arg3: memref<1x8xf32, #tpu.memory_space<vmem>>, %arg4: memref<1x8xf32, #tpu.memory_space<vmem>>) attributes {dimension_semantics = [#tpu.dimension_semantics<parallel>], iteration_bounds = array<i64: 1>, scalar_prefetch = 0 : i64, scratch_operands = 0 : i64, tpu.core_type = #tpu.core_type<tc>, window_params = [{transform_indices = @transform_0, window_bounds = array<i64: 5, 8>}, {transform_indices = @transform_1, window_bounds = array<i64: 1, 8>}, {transform_indices = @transform_2, window_bounds = array<i64: 1, 8>}, {transform_indices = @transform_3, window_bounds = array<i64: 1, 8>}]} {
    %c0 = arith.constant 0 : index
    %c0_0 = arith.constant 0 : index
    %0 = vector.load %arg1[%c0, %c0_0] : memref<5x8xf32, #tpu.memory_space<vmem>>, vector<5x8xf32>
    %c0_1 = arith.constant 0 : index
    %c0_2 = arith.constant 0 : index
    %1 = vector.load %arg2[%c0_1, %c0_2] : memref<1x8xi32, #tpu.memory_space<vmem>>, vector<1x8xi32>
    %c0_3 = arith.constant 0 : index
    %c0_4 = arith.constant 0 : index
    %2 = vector.load %arg3[%c0_3, %c0_4] : memref<1x8xf32, #tpu.memory_space<vmem>>, vector<1x8xf32>
    %3 = tpu.iota {dimensions = array<i32: 0>} : vector<5x8xi32>
    %4 = vector.broadcast %1 : vector<1x8xi32> to vector<5x8xi32>
    %5 = arith.cmpi eq, %3, %4 : vector<5x8xi32>
    %cst = arith.constant dense<0xFF800000> : vector<8xf32>
    %6 = vector.multi_reduction <maximumf>, %0, %cst [0] : vector<5x8xf32> to vector<8xf32>
    %7 = vector.shape_cast %6 : vector<8xf32> to vector<1x8xf32>
    %8 = vector.broadcast %7 : vector<1x8xf32> to vector<5x8xf32>
    %9 = arith.subf %0, %8 : vector<5x8xf32>
    %10 = math.exp %9 : vector<5x8xf32>
    %cst_5 = arith.constant dense<0.000000e+00> : vector<8xf32>
    %11 = vector.multi_reduction <add>, %10, %cst_5 [0] : vector<5x8xf32> to vector<8xf32>
    %12 = vector.shape_cast %11 : vector<8xf32> to vector<1x8xf32>
    %13 = math.log %12 : vector<1x8xf32>
    %14 = arith.addf %7, %13 : vector<1x8xf32>
    %cst_6 = arith.constant 0.000000e+00 : f32
    %15 = vector.broadcast %cst_6 : f32 to vector<5x8xf32>
    %16 = arith.select %5, %0, %15 : vector<5x8xi1>, vector<5x8xf32>
    %cst_7 = arith.constant dense<0.000000e+00> : vector<8xf32>
    %17 = vector.multi_reduction <add>, %16, %cst_7 [0] : vector<5x8xf32> to vector<8xf32>
    %18 = vector.shape_cast %17 : vector<8xf32> to vector<1x8xf32>
    %19 = arith.subf %14, %18 : vector<1x8xf32>
    %cst_8 = arith.constant 0.000000e+00 : f32
    %20 = vector.broadcast %cst_8 : f32 to vector<1x8xf32>
    %21 = arith.subf %20, %19 : vector<1x8xf32>
    %22 = math.exp %21 : vector<1x8xf32>
    %cst_9 = arith.constant 1.000000e+00 : f32
    %23 = vector.broadcast %cst_9 : f32 to vector<1x8xf32>
    %24 = arith.subf %23, %22 : vector<1x8xf32>
    %cst_10 = arith.constant 0.000000e+00 : f32
    %25 = vector.broadcast %cst_10 : f32 to vector<1x8xf32>
    %26 = arith.maximumf %24, %25 : vector<1x8xf32>
    %27 = arith.mulf %26, %26 : vector<1x8xf32>
    %28 = arith.mulf %2, %27 : vector<1x8xf32>
    %29 = arith.mulf %28, %19 : vector<1x8xf32>
    %c0_11 = arith.constant 0 : index
    %c0_12 = arith.constant 0 : index
    %30 = vector.load %arg4[%c0_11, %c0_12] : memref<1x8xf32, #tpu.memory_space<vmem>>, vector<1x8xf32>
    tpu.vector_store %arg4[%c0_11, %c0_12], %29 {strides = array<i32>} : memref<1x8xf32, #tpu.memory_space<vmem>>, vector<1x8xf32>,
    return
  }
  func.func @transform_0(%arg0: i32) -> (i32, i32) {
    %c0_i32 = arith.constant 0 : i32
    %c0_i32_0 = arith.constant 0 : i32
    return %c0_i32, %arg0 : i32, i32
  }
  func.func @transform_1(%arg0: i32) -> (i32, i32) {
    %c0_i32 = arith.constant 0 : i32
    %c0_i32_0 = arith.constant 0 : i32
    return %c0_i32, %arg0 : i32, i32
  }
  func.func @transform_2(%arg0: i32) -> (i32, i32) {
    %c0_i32 = arith.constant 0 : i32
    %c0_i32_0 = arith.constant 0 : i32
    return %c0_i32, %arg0 : i32, i32
  }
  func.func @transform_3(%arg0: i32) -> (i32, i32) {
    %c0_i32 = arith.constant 0 : i32
    %c0_i32_0 = arith.constant 0 : i32
    return %c0_i32, %arg0 : i32, i32
  }
}

</mosaic_0001>

<bundles_post_ra>
// kernel: tpu_custom_call.1
= control target key start
LH: loop header
LB: loop body
LE: loop exit
PB: predicated region body
PF: predicated region fallthrough
CT: control target
= control target key end

     0   :  { %8 = vsyncpa [#allocation3], 0  ;;  %s234_s0 = inlined_call_operand.hbm [shape: f32[5,8], index: 0, kind: input, shape index: {}]   ;;  %s235_s1 = inlined_call_operand.hbm [shape: s32[1,8], index: 1, kind: input, shape index: {}]   ;;  %s236_s2 = inlined_call_operand.vmem [shape: f32[1,8], index: 2, kind: input, shape index: {}]   ;;  %s237_s3 = inlined_call_operand.hbm [shape: f32[1,8], index: 3, kind: output, shape index: {}]  }
   0x1   :  { %9 = vsyncpa [#allocation6], 0 }
   0x2   :  { %10 = vsyncpa [#allocation4], 0  ;;  %s16_s14 = sshll.u32 %s234_s0, 4  ;;  %s196_s15 = smov [#allocation2]   ;;  %s17_s14 = int_to_ptr.hbm [resolvable:$true] %s16_s14 }
   0x3   :  { %s18_s16 = sshll.u32 %s196_s15, 4  ;;  %s27_s19 = sshll.u32 %s235_s1, 4  ;;  %s19_s16 = int_to_ptr.vmem [resolvable:$true] %s18_s16  ;;  %s28_s19 = int_to_ptr.hbm [resolvable:$true] %s27_s19 }
   0x4   :  { %21 = dma.hbm_to_vmem [thread:$0]  %s17_s14, 128, %s19_s16, [#allocation3]  }
   0x5   :  { %s197_s20 = smov [#allocation5]  }
   0x6   :  { %s29_s21 = sshll.u32 %s197_s20, 4  ;;  %s30_s21 = int_to_ptr.vmem [resolvable:$true] %s29_s21 }
   0x7   :  { %32 = dma.hbm_to_vmem [thread:$0]  %s28_s19, 16, %s30_s21, [#allocation6]  }
   0x8   :  { %190 = dma.done.wait [#allocation3], 128  }
   0x9   :  { %191 = vsyncadd [#allocation3], 4294967168 }
   0xa   :  { %192 = dma.done.wait [#allocation6], 16  }
   0xb   :  { %193 = vsyncadd [#allocation6], 4294967280  ;;  %vm50_vm0 = vcmask 61440   ;;  %v43_v0 = vld [vmem:[#allocation2] sm:$0x1f]  ;;  %v46_v5 = vlaneseq  ;;  %s198_s22 = smov [#allocation7]  }
   0xc   :  { %v51_v1 = vsel %vm50_vm0, %v43_v0, -inf  ;;  %v111_v9 = vld [vmem:[#allocation5] ss:$0 sm:$0xff]  ;;  %v45_v38 = vld [vmem:[%s236_s2] sm:$0x1]  ;;  %s95_s23 = sshll.u32 %s198_s22, 4  ;;  %s96_s23 = int_to_ptr.vmem [resolvable:$true] %s95_s23 }
   0xd   :  { %v52_v2 = vrot.slane %v51_v1, 4  ;;  %v47_v8 = vshrl.u32 %v46_v5, 7  ;;  %s97_s26 = sshll.u32 %s237_s3, 4  ;;  %vm88_vm2 = vcmask 57344   ;;  %s98_s26 = int_to_ptr.hbm [resolvable:$true] %s97_s26 }
   0xf   :  { %v53_v3 = vmax.f32 %v51_v1, %v52_v2  ;;  %vm49_vm1 = vcmp.eq.s32.totalorder %v47_v8, %v111_v9 }
  0x10   :  { %v71_v13 = vsel %vm49_vm1, %v43_v0, 0.0 }
  0x11   :  { %v54_v4 = vrot.slane %v53_v3, 2  ;;  %v72_v14 = vsel %vm50_vm0, %v71_v13, 0.0 }
  0x12   :  { %v73_v17 = vrot.slane %v72_v14, 4 }
  0x13   :  { %v55_v6 = vmax.f32 %v53_v3, %v54_v4 }
  0x14   :  { %v74_v20 = vadd.f32 %v73_v17, %v72_v14 }
  0x15   :  { %v56_v7 = vrot.slane %v55_v6, 1 }
  0x16   :  { %v75_v23 = vrot.slane %v74_v20, 2 }
  0x17   :  { %v57_v10 = vmax.f32 %v55_v6, %v56_v7 }
  0x18   :  { %v76_v26 = vadd.f32 %v75_v23, %v74_v20 }
  0x19   :  { %v58_v11 = vsub.f32 %v43_v0, %v57_v10 }
  0x1a   :  { %v77_v27 = vrot.slane %v76_v26, 1 }
  0x1b   :  { %v59_v12 = vmul.f32 1.442695, %v58_v11 }
  0x1c   :  { %v78_v30 = vadd.f32 %v77_v27, %v76_v26 }
  0x1d   :  { %112 = vpow2.f32 %v59_v12 }
  0x23   :  { %v113_v15 = vpop.eup %112 }
  0x24   :  { %v61_v16 = vsel %vm50_vm0, %v113_v15, 0.0 }
  0x25   :  { %v62_v18 = vrot.slane %v61_v16, 4 }
  0x27   :  { %v63_v19 = vadd.f32 %v62_v18, %v61_v16 }
  0x29   :  { %v64_v21 = vrot.slane %v63_v19, 2 }
  0x2b   :  { %v65_v22 = vadd.f32 %v64_v21, %v63_v19 }
  0x2d   :  { %v66_v24 = vrot.slane %v65_v22, 1 }
  0x2f   :  { %v67_v25 = vadd.f32 %v66_v24, %v65_v22 }
  0x31   :  { %114 = vlog2.f32 %v67_v25 }
  0x37   :  { %v115_v28 = vpop.eup %114 }
  0x38   :  { %v69_v29 = vmul.f32 0.6931472, %v115_v28 }
  0x3a   :  { %v70_v31 = vadd.f32 %v69_v29, %v57_v10 }
  0x3c   :  { %v79_v32 = vsub.f32 %v70_v31, %v78_v30 }
  0x3e   :  { %v80_v33 = vsub.f32 0.0, %v79_v32 }
  0x40   :  { %v81_v34 = vmul.f32 1.442695, %v80_v33 }
  0x42   :  { %116 = vpow2.f32 %v81_v34 }
  0x48   :  { %v117_v35 = vpop.eup %116 }
  0x49   :  { %v83_v36 = vsub.f32 1.0, %v117_v35 }
  0x4b   :  { %v84_v37 = vmax.f32 %v83_v36, 0.0 }
  0x4d   :  { %v85_v39 = vmul.f32 %v84_v37, %v84_v37 }
  0x4f   :  { %v86_v40 = vmul.f32 %v85_v39, %v45_v38 }
  0x51   :  { %v87_v41 = vmul.f32 %v86_v40, %v79_v32 }
  0x53   :  { %89 = vst.msk [vmem:[#allocation7] sm:$0x1] %vm88_vm2, %v87_v41 }
  0x54   :  { %100 = dma.vmem_to_hbm [thread:$0]  %s96_s23, 16, %s98_s26, [#allocation4]  }
  0x55   :  { %194 = dma.done.wait [#allocation4], 16  }
  0x56   :  { %195 = vsyncadd [#allocation4], 4294967280 }
  0x57   :  { %105 = vsyncpa [#allocation3], 1 }
  0x58   :  { %106 = vsyncpa [#allocation6], 1 }
  0x59   :  { %107 = vsyncpa [#allocation4], 1 }

</bundles_post_ra>
